<compile_context>
chip_gen: v7x
topology: tpu7x:2x2x1
jax: 0.10.0
libtpu: 0.0.40
codegen_flags: <defaults>
</compile_context>

<pallas_src>
import jax
import jax.numpy as jnp
from jax.experimental import pallas as pl
from jax.experimental.pallas import tpu as pltpu


# ---------------------------------------------------------------------------
# Kernel: one block of rows through the two-layer MLP.
# ---------------------------------------------------------------------------
def _ffn_kernel(x_ref, w1_ref, b1_ref, w2_ref, b2_ref, o_ref):
    x = x_ref[...]                                                        # (TM, C)
    h = jnp.dot(x, w1_ref[...], preferred_element_type=jnp.float32) + b1_ref[...]
    h = jnp.maximum(h, 0.0)                                               # ReLU
    # TODO(synk): nn.Dropout skipped (inference-mode identity).
    y = jnp.dot(h, w2_ref[...], preferred_element_type=jnp.float32) + b2_ref[...]
    # TODO(synk): second nn.Dropout skipped (inference-mode identity).
    o_ref[...] = y.astype(o_ref.dtype)


# ---------------------------------------------------------------------------
# Wrapper
# ---------------------------------------------------------------------------
def mlp_feedforward_pallas(x, w1, b1, w2, b2, *, block_rows=None):
    """x: (B, T, d_model); w1: (d_model, F); b1: (F,); w2: (F, d_model); b2: (d_model,)."""
    B, T, C = x.shape
    F = w1.shape[1]
    assert w1.shape == (C, F) and w2.shape == (F, C)

    M = B * T
    xf = x.reshape(M, C)
    b1 = b1.reshape(1, F)
    b2 = b2.reshape(1, C)

    if block_rows is None:
        # Largest MXU-friendly row tile that divides M (256 rows fills the MXU on all gens).
        block_rows = M
        for cand in (256, 128, 64, 32, 16, 8):
            if M % cand == 0:
                block_rows = cand
                break
    grid = (M // block_rows,)

    out = pl.pallas_call(
        _ffn_kernel,
        grid=grid,
        in_specs=[
            pl.BlockSpec((block_rows, C), lambda i: (i, 0)),   # activations, tiled by rows
            pl.BlockSpec((C, F), lambda i: (0, 0)),            # W1 (resident across grid)
            pl.BlockSpec((1, F), lambda i: (0, 0)),            # b1
            pl.BlockSpec((F, C), lambda i: (0, 0)),            # W2 (resident across grid)
            pl.BlockSpec((1, C), lambda i: (0, 0)),            # b2
        ],
        out_specs=pl.BlockSpec((block_rows, C), lambda i: (i, 0)),
        out_shape=jax.ShapeDtypeStruct((M, C), x.dtype),
        compiler_params=pltpu.CompilerParams(dimension_semantics=("parallel",)),
    )(xf, w1, b1, w2, b2)
    return out.reshape(B, T, C)


# ---------------------------------------------------------------------------
# Pure-JAX reference (same math as the PyTorch module in eval mode).
# ---------------------------------------------------------------------------
def _reference(x, w1, b1, w2, b2):
    h = jnp.maximum(x @ w1 + b1, 0.0)
    return h @ w2 + b2


# ---------------------------------------------------------------------------
if __name__ == "__main__":
    B = 2          # batch
    T = 256        # sequence length
    C = 128        # d_model
    F = 256        # feedforward_dim (kept small for the demo; default PyTorch value is 2048)

    key = jax.random.PRNGKey(0)
    k0, k1, k2, k3, k4 = jax.random.split(key, 5)

    x = jax.random.normal(k0, (B, T, C), jnp.float32)
    # Conv1d(k=1) weights, stored directly in matmul orientation (in_ch, out_ch).
    w1 = jax.random.normal(k1, (C, F), jnp.float32) * (1.0 / jnp.sqrt(C))
    b1 = jax.random.normal(k2, (F,), jnp.float32) * 0.1
    w2 = jax.random.normal(k3, (F, C), jnp.float32) * (1.0 / jnp.sqrt(F))
    b2 = jax.random.normal(k4, (C,), jnp.float32) * 0.1

    out = mlp_feedforward_pallas(x, w1, b1, w2, b2)
    jax.block_until_ready(out)

    ref = _reference(x, w1, b1, w2, b2)
    assert out.shape == (B, T, C)
    assert jnp.allclose(out, ref, atol=1e-3, rtol=1e-3), "output mismatch vs reference"

    print("KERNEL_OK")
</pallas_src>

<mosaic_0001>
module attributes {stable_mosaic.version = 11 : i64} {
  func.func @_ffn_kernel(%arg0: i32, %arg1: memref<256x128xf32, #tpu.memory_space<vmem>>, %arg2: memref<128x256xf32, #tpu.memory_space<vmem>>, %arg3: memref<1x256xf32, #tpu.memory_space<vmem>>, %arg4: memref<256x128xf32, #tpu.memory_space<vmem>>, %arg5: memref<1x128xf32, #tpu.memory_space<vmem>>, %arg6: memref<256x128xf32, #tpu.memory_space<vmem>>) attributes {dimension_semantics = [#tpu.dimension_semantics<parallel>], iteration_bounds = array<i64: 2>, scalar_prefetch = 0 : i64, scratch_operands = 0 : i64, tpu.core_type = #tpu.core_type<tc>, window_params = [{transform_indices = @transform_0, window_bounds = array<i64: 256, 128>}, {pipeline_mode = #tpu.pipeline_mode<synchronous>, transform_indices = @transform_1, window_bounds = array<i64: 128, 256>}, {pipeline_mode = #tpu.pipeline_mode<synchronous>, transform_indices = @transform_2, window_bounds = array<i64: 1, 256>}, {pipeline_mode = #tpu.pipeline_mode<synchronous>, transform_indices = @transform_3, window_bounds = array<i64: 256, 128>}, {pipeline_mode = #tpu.pipeline_mode<synchronous>, transform_indices = @transform_4, window_bounds = array<i64: 1, 128>}, {transform_indices = @transform_5, window_bounds = array<i64: 256, 128>}]} {
    %c0 = arith.constant 0 : index
    %c0_0 = arith.constant 0 : index
    %0 = vector.load %arg1[%c0, %c0_0] : memref<256x128xf32, #tpu.memory_space<vmem>>, vector<256x128xf32>
    %c0_1 = arith.constant 0 : index
    %c0_2 = arith.constant 0 : index
    %1 = vector.load %arg2[%c0_1, %c0_2] : memref<128x256xf32, #tpu.memory_space<vmem>>, vector<128x256xf32>
    %cst = arith.constant dense<0.000000e+00> : vector<256x256xf32>
    %2 = tpu.matmul %0, %1, %cst {dimension_numbers = #tpu.dot_dimension_numbers<[1], [0], [0], [1], [0, 0, 1, 1], [], []>} : vector<256x128xf32>, vector<128x256xf32>, vector<256x256xf32> -> vector<256x256xf32>
    %c0_3 = arith.constant 0 : index
    %c0_4 = arith.constant 0 : index
    %3 = vector.load %arg3[%c0_3, %c0_4] : memref<1x256xf32, #tpu.memory_space<vmem>>, vector<1x256xf32>
    %4 = vector.broadcast %3 : vector<1x256xf32> to vector<256x256xf32>
    %5 = arith.addf %2, %4 : vector<256x256xf32>
    %cst_5 = arith.constant 0.000000e+00 : f32
    %6 = vector.broadcast %cst_5 : f32 to vector<256x256xf32>
    %7 = arith.maximumf %5, %6 : vector<256x256xf32>
    %c0_6 = arith.constant 0 : index
    %c0_7 = arith.constant 0 : index
    %8 = vector.load %arg4[%c0_6, %c0_7] : memref<256x128xf32, #tpu.memory_space<vmem>>, vector<256x128xf32>
    %cst_8 = arith.constant dense<0.000000e+00> : vector<256x128xf32>
    %9 = tpu.matmul %7, %8, %cst_8 {dimension_numbers = #tpu.dot_dimension_numbers<[1], [0], [0], [1], [0, 0, 1, 1], [], []>} : vector<256x256xf32>, vector<256x128xf32>, vector<256x128xf32> -> vector<256x128xf32>
    %c0_9 = arith.constant 0 : index
    %c0_10 = arith.constant 0 : index
    %10 = vector.load %arg5[%c0_9, %c0_10] : memref<1x128xf32, #tpu.memory_space<vmem>>, vector<1x128xf32>
    %11 = vector.broadcast %10 : vector<1x128xf32> to vector<256x128xf32>
    %12 = arith.addf %9, %11 : vector<256x128xf32>
    %c0_11 = arith.constant 0 : index
    %c0_12 = arith.constant 0 : index
    %13 = vector.load %arg6[%c0_11, %c0_12] : memref<256x128xf32, #tpu.memory_space<vmem>>, vector<256x128xf32>
    tpu.vector_store %arg6[%c0_11, %c0_12], %12 {strides = array<i32>} : memref<256x128xf32, #tpu.memory_space<vmem>>, vector<256x128xf32>,
    return
  }
  func.func @transform_0(%arg0: i32) -> (i32, i32) {
    %c0_i32 = arith.constant 0 : i32
    %c0_i32_0 = arith.constant 0 : i32
    return %arg0, %c0_i32 : i32, i32
  }
  func.func @transform_1(%arg0: i32) -> (i32, i32) {
    %c0_i32 = arith.constant 0 : i32
    %c0_i32_0 = arith.constant 0 : i32
    %c0_i32_1 = arith.constant 0 : i32
    return %c0_i32, %c0_i32_0 : i32, i32
  }
  func.func @transform_2(%arg0: i32) -> (i32, i32) {
    %c0_i32 = arith.constant 0 : i32
    %c0_i32_0 = arith.constant 0 : i32
    %c0_i32_1 = arith.constant 0 : i32
    return %c0_i32, %c0_i32_0 : i32, i32
  }
  func.func @transform_3(%arg0: i32) -> (i32, i32) {
    %c0_i32 = arith.constant 0 : i32
    %c0_i32_0 = arith.constant 0 : i32
    %c0_i32_1 = arith.constant 0 : i32
    return %c0_i32, %c0_i32_0 : i32, i32
  }
  func.func @transform_4(%arg0: i32) -> (i32, i32) {
    %c0_i32 = arith.constant 0 : i32
    %c0_i32_0 = arith.constant 0 : i32
    %c0_i32_1 = arith.constant 0 : i32
    return %c0_i32, %c0_i32_0 : i32, i32
  }
  func.func @transform_5(%arg0: i32) -> (i32, i32) {
    %c0_i32 = arith.constant 0 : i32
    %c0_i32_0 = arith.constant 0 : i32
    return %arg0, %c0_i32 : i32, i32
  }
}

</mosaic_0001>

<bundles_post_ra>
// kernel: tpu_custom_call.1
= control target key start
LH: loop header
LB: loop body
LE: loop exit
PB: predicated region body
PF: predicated region fallthrough
CT: control target
= control target key end

     0   :  { %10 = vsyncpa [#allocation3], 0  ;;  %s1966_s0 = inlined_call_operand.hbm [shape: f32[512,128], index: 0, kind: input, shape index: {}]   ;;  %s1967_s1 = inlined_call_operand.hbm [shape: f32[128,256], index: 1, kind: input, shape index: {}]   ;;  %s1968_s2 = inlined_call_operand.vmem [shape: f32[1,256], index: 2, kind: input, shape index: {}]   ;;  %s1969_s3 = inlined_call_operand.hbm [shape: f32[256,128], index: 3, kind: input, shape index: {}]   ;;  %s1970_s4 = inlined_call_operand.vmem [shape: f32[1,128], index: 4, kind: input, shape index: {}]   ;;  %s1971_s5 = inlined_call_operand.hbm [shape: f32[512,128], index: 5, kind: output, shape index: {}]  }
   0x1   :  { %12 = vsyncpa [#allocation3 + $0x1], 0 }
   0x2   :  { %13 = vsyncpa [#allocation6], 0 }
   0x3   :  { %14 = vsyncpa [#allocation4], 0 }
   0x4   :  { %16 = vsyncpa [#allocation4 + $0x1], 0  ;;  %s1481_s18 = smov 0   ;;  %s1483_s19 = smov 0  }
   0x5   :  { %s1485_s20 = smov 0   ;;  %s1487_s21 = smov 0  }
   0x6 LB: > { %s1502_s22 = sadd.s32 4294967295, %s1437_s21   ;;  %s1073_s23 = sadd.s32 4294967294, %s1437_s21   ;;  %s1437_s21 = sphi %s1487_s21, %s1991_s21   ;;  %s1433_s20 = sphi %s1485_s20, %s1990_s20   ;;  %s1429_s19 = sphi %s1483_s19, %s1989_s19   ;;  %s1425_s18 = sphi %s1481_s18, %s1988_s18  }
   0x7   : > { %p42_p0 = scmp.ne.s32.totalorder %s1429_s19, %s1425_s18  ;;  %p1972_p1 = scmp.eq.s32.totalorder %s1502_s22, 0 }
   0x8   : > { %p156_p3 = scmp.eq.s32.totalorder %s1073_s23, 1  ;;  %p1074_p5 = scmp.ge.s32.totalorder %s1437_s21, 1 }
   0x9   : > { %p1511_p4 = por %p1972_p1, %p42_p0  ;;  %p163_p7 = scmp.lt.s32.totalorder %s1437_s21, 3 }
   0xa   : > { %p1516_p6 = por %p156_p3, %p42_p0  ;;  %s1439_s27 = smov [#allocation5]  }
   0xb   : > { %s1975_s24 = scalar_select %p1511_p4, 1, 0 }
   0xc   : > { %s1976_s25 = scalar_select %p1516_p6, 1, 0 }
   0xd   : > { %p1521_p8 = pnand %p1074_p5, %p163_p7  ;;  %s175_s28 = sshll.u32 %s1439_s27, 4  ;;  %s1525_s28 = int_to_ptr.vmem [resolvable:$true] %s175_s28 }
   0xe   : > { %s1440_s30 = smov [#allocation7]   ;;  %s1281_s9 = scalar_lea.hbm %s1967_s1, 4096 }
   0xf   : > { %p1218_p9 = pneg %p1521_p8  ;;  %s191_s6 = sshll.u32 %s1440_s30, 4  ;;  %s1536_s6 = int_to_ptr.vmem [resolvable:$true] %s191_s6 }
  0x10   : > { %p1282_p12 = scmp.ne.s32.totalorder %s1967_s1, %s1281_s9  ;;  %p1288_p5 = scmp.lt.u32.totalorder %s1281_s9, %s1967_s1 }
  0x11   : > { %p1532_p11 = pnand %p1218_p9, %p1972_p1 }
  0x13   : > { %p1283_p13 = pneg %p1532_p11 }
  0x15   : > { %p1284_p0 = pnand %p1283_p13, %p1282_p12 }
  0x17   : > { %p1285_p3 = pneg %p1284_p0 }
  0x19   : > { %p1290_p7 = pnand %p1288_p5, %p1285_p3 }
  0x1b   : > { %1293 = shalt.err (!%p1290_p7)
}
  0x1c   : > { %s1294_s14 = scalar_lea.vmem %s1525_s28, 4096  ;;  %p1302_p2 = scmp.lt.s32.totalorder %s1525_s28, %s1525_s28 }
  0x1d   : > { %p1295_p9 = scmp.ne.s32.totalorder %s1525_s28, %s1294_s14  ;;  %p1303_p12 = scmp.lt.s32.totalorder %s1294_s14, %s1294_s14 }
  0x1f   : > { %p1297_p10 = pnand %p1295_p9, %p1283_p13  ;;  %p1304_p0 = por %p1303_p12, %p1302_p2 }
  0x21   : > { %p1298_p1 = pneg %p1297_p10 }
  0x23   : > { %p1305_p6 = pnand %p1304_p0, %p1298_p1 }
  0x25   : > { %1308 = shalt.err (!%p1305_p6)
}
  0x26   : > { %s1441_s15 = smov 256   ;;  %s1442_s16 = smov 16  }
  0x27   : > { %1221 = dma.hbm_to_vmem [thread:$0]  (!%p1532_p11), %s1967_s1, 4096, %s1525_s28, [#allocation6], %s1441_s15, %s1441_s15, %s1442_s16  }
  0x28   : > { %s1309_s7 = scalar_lea.hbm %s1969_s3, 4096 }
  0x29   : > { %p1310_p2 = scmp.ne.s32.totalorder %s1969_s3, %s1309_s7  ;;  %p1316_p10 = scmp.lt.u32.totalorder %s1309_s7, %s1969_s3 }
  0x2b   : > { %p1312_p1 = pnand %p1310_p2, %p1283_p13 }
  0x2d   : > { %p1313_p6 = pneg %p1312_p1 }
  0x2f   : > { %p1318_p3 = pnand %p1316_p10, %p1313_p6 }
  0x31   : > { %1321 = shalt.err (!%p1318_p3)
}
  0x32   : > { %s1322_s28 = scalar_lea.vmem %s1536_s6, 4096  ;;  %p1330_p12 = scmp.lt.s32.totalorder %s1536_s6, %s1536_s6 }
  0x33   : > { %p1323_p5 = scmp.ne.s32.totalorder %s1536_s6, %s1322_s28  ;;  %p1331_p0 = scmp.lt.s32.totalorder %s1322_s28, %s1322_s28 }
  0x35   : > { %p1325_p7 = pnand %p1323_p5, %p1283_p13  ;;  %p1332_p2 = por %p1331_p0, %p1330_p12 }
  0x37   : > { %p1326_p9 = pneg %p1325_p7 }
  0x39   : > { %p1333_p1 = pnand %p1332_p2, %p1326_p9 }
  0x3b   : > { %1336 = shalt.err (!%p1333_p1)
}
  0x3c   : > { %s1443_s12 = smov 128   ;;  %s1444_s13 = smov 8  }
  0x3d   : > { %1224 = dma.hbm_to_vmem [thread:$0]  (!%p1532_p11), %s1969_s3, 4096, %s1536_s6, [#allocation6], %s1443_s12, %s1443_s12, %s1444_s13  }
  0x3e   : > { %s1594_s16 = sadd.s32 1, %s1437_s21   ;;  %s29_s23 = sadd.s32 1, %s1433_s20 }
  0x3f   : > { %s26_s17 = ssub.s32 %s1437_s21, %s1594_s16  ;;  %p36_p6 = scmp.ne.s32.totalorder %s1433_s20, %s1429_s19 }
  0x40   : > { %p27_p13 = scmp.eq.s32.totalorder %s26_s17, 0  ;;  %p37_p10 = scmp.eq.s32.totalorder %s1437_s21, 0 }
  0x41   : > { %p1979_p5 = scmp.eq.s32.totalorder %s1502_s22, 1  ;;  %p1235_p9 = scmp.lt.s32.totalorder %s1437_s21, 2 }
  0x42   : > { %s1603_s27 = scalar_select %p27_p13, %s1433_s20, %s29_s23  }
  0x43   : > { %p38_p3 = por %p37_p10, %p36_p6  ;;  %p1607_p7 = por %p1979_p5, %p36_p6 }
  0x44   : > { %s208_s30 = sand.u32 1, %s1433_s20   ;;  %s1092_s6 = sshll.u32 %s1437_s21, 12 }
  0x45   : > { %s1980_s29 = scalar_select %p1607_p7, 1, 0 }
  0x46   : > { %s1078_s7 = sshll.u32 %s208_s30, 8  ;;  %s1617_s10 = scalar_lea.hbm %s1966_s0, %s1092_s6 }
  0x47   : > { %s212_s11 = scalar_lea.vmem [#allocation2], %s1078_s7  ;;  %p1621_p11 = pnand %p1235_p9, %p38_p3 }
  0x48   : > { %s219_s28 = sshll.u32 %s212_s11, 4  ;;  %s1625_s15 = scalar_lea.sflag [#allocation3], %s208_s30  ;;  %s1619_s28 = int_to_ptr.vmem [resolvable:$true] %s219_s28 }
  0x49   : > { %s1337_s17 = scalar_lea.hbm %s1617_s10, 4096  ;;  %p1339_p0 = pneg %p1621_p11 }
  0x4a   : > { %p1338_p12 = scmp.ne.s32.totalorder %s1617_s10, %s1337_s17  ;;  %s1342_s6 = scalar_lea.hbm %s1966_s0, 8192 }
  0x4b   : > { %p1343_p13 = scmp.lt.u32.totalorder %s1617_s10, %s1966_s0  ;;  %p1344_p6 = scmp.lt.u32.totalorder %s1342_s6, %s1337_s17 }
  0x4c   : > { %p1340_p2 = pnand %p1339_p0, %p1338_p12  ;;  %p1346_p3 = scmp.lt.u32.totalorder %s1337_s17, %s1617_s10 }
  0x4d   : > { %p1345_p10 = por %p1344_p6, %p1343_p13 }
  0x4e   : > { %p1341_p1 = pneg %p1340_p2 }
  0x4f   : > { %p1347_p5 = por %p1346_p3, %p1345_p10 }
  0x51   : > { %p1348_p9 = pnand %p1347_p5, %p1341_p1 }
  0x53   : > { %1351 = shalt.err (!%p1348_p9)
}
  0x54   : > { %s1352_s30 = scalar_lea.vmem %s1619_s28, 4096  ;;  %s1445_s11 = smov [#allocation2]  }
  0x55   : > { %p1353_p12 = scmp.ne.s32.totalorder %s1619_s28, %s1352_s30  ;;  %s1357_s23 = sshll.u32 %s1445_s11, 4  ;;  %s1358_s23 = int_to_ptr.vmem [resolvable:$false] %s1357_s23 }
  0x56   : > { %s1359_s7 = scalar_lea.vmem %s1358_s23, 8192  ;;  %p1360_p4 = scmp.lt.s32.totalorder %s1619_s28, %s1358_s23 }
  0x57   : > { %p1355_p2 = pnand %p1353_p12, %p1339_p0  ;;  %p1361_p13 = scmp.lt.s32.totalorder %s1359_s7, %s1352_s30 }
  0x59   : > { %p1356_p7 = pneg %p1355_p2  ;;  %p1362_p6 = por %p1361_p13, %p1360_p4 }
  0x5b   : > { %p1363_p10 = pnand %p1362_p6, %p1356_p7 }
  0x5d   : > { %1366 = shalt.err (!%p1363_p10)
}
  0x5e   : > { %1228 = dma.hbm_to_vmem [thread:$0]  (!%p1621_p11), %s1617_s10, 4096, %s1619_s28, %s1625_s15, %s1443_s12, %s1443_s12, %s1444_s13  }
  0x5f   : > { %231 = sbr.rel (%p1521_p8) target bundleno = 712 (0x2c8), region = 40  ;;  %s1659_s17 = sand.u32 (!%p1521_p8), 1, %s1429_s19  }
  0x60   : > { %s1082_s6 = sshll.u32 (!%p1521_p8), %s1659_s17, 8  ;;  %s234_s8 = scalar_lea.sflag (!%p1521_p8), [#allocation3], %s1659_s17 }
  0x61   : > { %s1665_s14 = scalar_lea.vmem (!%p1521_p8), [#allocation2], %s1082_s6  ;;  %p1982_p4 = scmp.ne.s32.totalorder (!%p1521_p8), %s1975_s24, 0 }
  0x66   : > { %1412 = dma.done.wait (%p1982_p4), %s234_s8, 4096  }
  0x67   : > { %1414 = vsyncadd (%p1982_p4), %s234_s8, 4294963200  ;;  %p1983_p7 = scmp.eq.s32.totalorder %s1502_s22, 0 }
  0x69   : > { %1416 = dma.done.wait (%p1983_p7), [#allocation6], 8192   ;;  %p1984_p8 = pmov %p1983_p7 }
  0x6a   : > { %v1446_v0 = vmov 0.0   ;;  %v307_v1 = vld [vmem:[#allocation5 + $0x8] sm:$0xff]  ;;  %v309_v2 = vld [vmem:[#allocation5 + $0x18] sm:$0xff]  ;;  %v306_v3 = vld [vmem:[#allocation5] sm:$0xff]  ;;  %v1447_v53 = vmov 0.0|0.0   ;;  %s1850_s10 = scalar_lea.vmem [#allocation8], %s1082_s6 }
  0x6b   : > { %1418 = vsyncadd (%p1984_p8), [#allocation6], 4294959104  ;;  %414 = vmatprep.mubr.f32.mxu0 %v1446_v0  ;;  %v1094_v4 = vpack.c.bf16 %v309_v2, %v307_v1  ;;  %v308_v5 = vld [vmem:[#allocation5 + $0x10] sm:$0xff]  ;;  %v311_v6 = vld [vmem:[#allocation5 + $0x28] sm:$0xff]  ;;  %1174 = vmatprep.subr.bf16.mxu1 %v1447_v53  ;;  %s1093_s28 = sshll.u32 %s1502_s22, 12  ;;  %s981_s15 = sshll.u32 %s1850_s10, 4  ;;  %s1920_s15 = int_to_ptr.vmem [resolvable:$true] %s981_s15 }
  0x6c   : > { %v313_v7 = vld [vmem:[#allocation5 + $0x38] sm:$0xff]  ;;  %v1096_v8 = vpack.c.bf16 %v308_v5, %v306_v3  ;;  %v310_v10 = vld [vmem:[#allocation5 + $0x20] sm:$0xff]  ;;  %v312_v11 = vld [vmem:[#allocation5 + $0x30] sm:$0xff]  ;;  %s1918_s11 = scalar_lea.hbm %s1971_s5, %s1093_s28  ;;  %s968_s23 = scalar_lea.sflag [#allocation4], %s1659_s17 }
  0x6d   : > { %v1098_v9 = vpack.c.bf16 %v313_v7, %v311_v6  ;;  %v315_v12 = vld [vmem:[#allocation5 + $0x48] sm:$0xff]  ;;  %1095 = vmatprep.subr.bf16.mxu0 %v1094_v4  ;;  %v317_v13 = vld [vmem:[#allocation5 + $0x58] sm:$0xff]  ;;  %v1100_v14 = vpack.c.bf16 %v312_v11, %v310_v10  ;;  %v314_v16 = vld [vmem:[#allocation5 + $0x40] sm:$0xff]  ;;  %s1367_s7 = scalar_lea.vmem %s1920_s15, 4096  ;;  %p1985_p0 = scmp.ne.s32.totalorder %s1980_s29, 0 }
  0x6e   : > { %1097 = vmatpush1.bf16.msra.mxu0 %v1096_v8  ;;  %v1102_v15 = vpack.c.bf16 %v317_v13, %v315_v12  ;;  %v316_v17 = vld [vmem:[#allocation5 + $0x50] sm:$0xff]  ;;  %v319_v18 = vld [vmem:[#allocation5 + $0x68] sm:$0xff]  ;;  %v321_v19 = vld [vmem:[#allocation5 + $0x78] sm:$0xff]  ;;  %p1368_p11 = scmp.ne.s32.totalorder %s1920_s15, %s1367_s7  ;;  %s1448_s22 = smov [#allocation8]  }
  0x6f   : > { %1099 = vmatprep.subr.bf16.mxu0 %v1098_v9  ;;  %v1104_v20 = vpack.c.bf16 %v316_v17, %v314_v16  ;;  %v1106_v21 = vpack.c.bf16 %v321_v19, %v319_v18  ;;  %v318_v22 = vld [vmem:[#allocation5 + $0x60] sm:$0xff]  ;;  %v320_v23 = vld [vmem:[#allocation5 + $0x70] sm:$0xff]  ;;  %v323_v24 = vld [vmem:[#allocation5 + $0x88] sm:$0xff]  ;;  %s1371_s6 = sshll.u32 %s1448_s22, 4  ;;  %s1372_s6 = int_to_ptr.vmem [resolvable:$false] %s1371_s6 }
  0x70   : > { %v325_v25 = vld [vmem:[#allocation5 + $0x98] sm:$0xff]  ;;  %v1108_v26 = vpack.c.bf16 %v320_v23, %v318_v22  ;;  %v322_v28 = vld [vmem:[#allocation5 + $0x80] sm:$0xff]  ;;  %v324_v29 = vld [vmem:[#allocation5 + $0x90] sm:$0xff]  ;;  %p1369_p1 = pnand %p1368_p11, %p1985_p0  ;;  %s1373_s8 = scalar_lea.vmem %s1372_s6, 8192 }
  0x71   : > { %v1110_v27 = vpack.c.bf16 %v325_v25, %v323_v24  ;;  %v327_v30 = vld [vmem:[#allocation5 + $0xa8] sm:$0xff]  ;;  %v329_v31 = vld [vmem:[#allocation5 + $0xb8] sm:$0xff]  ;;  %v1112_v32 = vpack.c.bf16 %v324_v29, %v322_v28  ;;  %v326_v34 = vld [vmem:[#allocation5 + $0xa0] sm:$0xff]  ;;  %p1374_p5 = scmp.lt.s32.totalorder %s1920_s15, %s1372_s6  ;;  %p1375_p9 = scmp.lt.s32.totalorder %s1373_s8, %s1367_s7 }
  0x72   : > { %1101 = vmatpush1.bf16.msra.mxu0 %v1100_v14  ;;  %v1114_v33 = vpack.c.bf16 %v329_v31, %v327_v30  ;;  %v328_v35 = vld [vmem:[#allocation5 + $0xb0] sm:$0xff]  ;;  %v331_v36 = vld [vmem:[#allocation5 + $0xc8] sm:$0xff]  ;;  %v333_v37 = vld [vmem:[#allocation5 + $0xd8] sm:$0xff]  ;;  %p1370_p3 = pneg %p1369_p1 }
  0x73   : > { %1103 = vmatprep.subr.bf16.mxu0 %v1102_v15  ;;  %v1116_v38 = vpack.c.bf16 %v328_v35, %v326_v34  ;;  %v1118_v39 = vpack.c.bf16 %v333_v37, %v331_v36  ;;  %v330_v40 = vld [vmem:[#allocation5 + $0xc0] sm:$0xff]  ;;  %v332_v41 = vld [vmem:[#allocation5 + $0xd0] sm:$0xff]  ;;  %v335_v42 = vld [vmem:[#allocation5 + $0xe8] sm:$0xff]  ;;  %p1376_p12 = por %p1375_p9, %p1374_p5 }
  0x74   : > { %v337_v43 = vld [vmem:[#allocation5 + $0xf8] sm:$0xff]  ;;  %v1120_v44 = vpack.c.bf16 %v332_v41, %v330_v40  ;;  %v334_v46 = vld [vmem:[#allocation5 + $0xe0] sm:$0xff]  ;;  %v336_v47 = vld [vmem:[#allocation5 + $0xf0] sm:$0xff] }
  0x75   : > { %v1122_v45 = vpack.c.bf16 %v337_v43, %v335_v42  ;;  %v1124_v48 = vpack.c.bf16 %v336_v47, %v334_v46  ;;  %v671_v49 = vld [vmem:[#allocation7] sm:$0xff]  ;;  %v672_v50 = vld [vmem:[#allocation7 + $0x8] sm:$0xff]  ;;  %v673_v54 = vld [vmem:[#allocation7 + $0x10] sm:$0xff]  ;;  %p1377_p2 = pnand %p1376_p12, %p1370_p3 }
  0x76   : > { %1105 = vmatpush1.bf16.msra.mxu0 %v1104_v20  ;;  %v274_v51 = vld [vmem:[%s1665_s14] sm:$0xff]  ;;  %v1127_v52 = vpack.c.bf16 %v672_v50, %v671_v49  ;;  %v674_v55 = vld [vmem:[#allocation7 + $0x18] sm:$0xff]  ;;  %v275_v56 = vld [vmem:[%s1665_s14 + $0x8] sm:$0xff] }
  0x77   : > { %1107 = vmatprep.subr.bf16.mxu0 %v1106_v21  ;;  %v1130_v57 = vpack.c.bf16 %v674_v55, %v673_v54  ;;  %v675_v58 = vld [vmem:[#allocation7 + $0x20] sm:$0xff]  ;;  %v676_v59 = vld [vmem:[#allocation7 + $0x28] sm:$0xff]  ;;  %v276_v60 = vld [vmem:[%s1665_s14 + $0x10] sm:$0xff] }
  0x78   : > { %1190 = vmatpush1.bf16.msra.mxu1 %v1127_v52  ;;  %v1133_v61 = vpack.c.bf16 %v676_v59, %v675_v58  ;;  %v677_v62 = vld [vmem:[#allocation7 + $0x30] sm:$0xff]  ;;  %v678_v63 = vld [vmem:[#allocation7 + $0x38] sm:$0xff]  ;;  %v679_v3 = vld [vmem:[#allocation7 + $0x40] sm:$0xff] }
  0x79   : > { %1175 = vmatprep.subr.bf16.mxu1 %v1447_v53  ;;  %v277_v1 = vld [vmem:[%s1665_s14 + $0x18] sm:$0xff]  ;;  %v1136_v2 = vpack.c.bf16 %v678_v63, %v677_v62  ;;  %v680_v4 = vld [vmem:[#allocation7 + $0x48] sm:$0xff]  ;;  %v278_v5 = vld [vmem:[%s1665_s14 + $0x20] sm:$0xff] }
  0x7a   : > { %1109 = vmatpush1.bf16.msra.mxu0 %v1108_v26  ;;  %v1139_v6 = vpack.c.bf16 %v680_v4, %v679_v3  ;;  %v681_v7 = vld [vmem:[#allocation7 + $0x50] sm:$0xff]  ;;  %v682_v8 = vld [vmem:[#allocation7 + $0x58] sm:$0xff]  ;;  %v279_v9 = vld [vmem:[%s1665_s14 + $0x28] sm:$0xff]  ;;  %v340_v4 = vlaneseq }
  0x7b   : > { %1111 = vmatprep.subr.bf16.mxu0 %v1110_v27  ;;  %v1142_v10 = vpack.c.bf16 %v682_v8, %v681_v7  ;;  %v683_v11 = vld [vmem:[#allocation7 + $0x60] sm:$0xff]  ;;  %v684_v12 = vld [vmem:[#allocation7 + $0x68] sm:$0xff]  ;;  %v280_v13 = vld [vmem:[%s1665_s14 + $0x30] sm:$0xff] }
  0x7c   : > { %1191 = vmatpush1.bf16.msra.mxu1 %v1130_v57  ;;  %v1145_v14 = vpack.c.bf16 %v684_v12, %v683_v11  ;;  %v685_v15 = vld [vmem:[#allocation7 + $0x70] sm:$0xff]  ;;  %v686_v16 = vld [vmem:[#allocation7 + $0x78] sm:$0xff]  ;;  %v687_v19 = vld [vmem:[#allocation7 + $0x80] sm:$0xff] }
  0x7d   : > { %1176 = vmatprep.subr.bf16.mxu1 %v1447_v53  ;;  %v281_v17 = vld [vmem:[%s1665_s14 + $0x38] sm:$0xff]  ;;  %v1148_v18 = vpack.c.bf16 %v686_v16, %v685_v15  ;;  %v688_v20 = vld [vmem:[#allocation7 + $0x88] sm:$0xff]  ;;  %v282_v21 = vld [vmem:[%s1665_s14 + $0x40] sm:$0xff] }
  0x7e   : > { %1113 = vmatpush1.bf16.msra.mxu0 %v1112_v32  ;;  %v1151_v22 = vpack.c.bf16 %v688_v20, %v687_v19  ;;  %v689_v23 = vld [vmem:[#allocation7 + $0x90] sm:$0xff]  ;;  %v690_v24 = vld [vmem:[#allocation7 + $0x98] sm:$0xff]  ;;  %v283_v25 = vld [vmem:[%s1665_s14 + $0x48] sm:$0xff] }
  0x7f   : > { %1115 = vmatprep.subr.bf16.mxu0 %v1114_v33  ;;  %v1154_v26 = vpack.c.bf16 %v690_v24, %v689_v23  ;;  %v691_v27 = vld [vmem:[#allocation7 + $0xa0] sm:$0xff]  ;;  %v692_v28 = vld [vmem:[#allocation7 + $0xa8] sm:$0xff]  ;;  %v284_v29 = vld [vmem:[%s1665_s14 + $0x50] sm:$0xff] }
  0x80   : > { %1192 = vmatpush1.bf16.msra.mxu1 %v1133_v61  ;;  %v1157_v30 = vpack.c.bf16 %v692_v28, %v691_v27  ;;  %v693_v31 = vld [vmem:[#allocation7 + $0xb0] sm:$0xff]  ;;  %v694_v32 = vld [vmem:[#allocation7 + $0xb8] sm:$0xff]  ;;  %v695_v35 = vld [vmem:[#allocation7 + $0xc0] sm:$0xff] }
  0x81   : > { %1177 = vmatprep.subr.bf16.mxu1 %v1447_v53  ;;  %v285_v33 = vld [vmem:[%s1665_s14 + $0x58] sm:$0xff]  ;;  %v1160_v34 = vpack.c.bf16 %v694_v32, %v693_v31  ;;  %v696_v36 = vld [vmem:[#allocation7 + $0xc8] sm:$0xff]  ;;  %v286_v37 = vld [vmem:[%s1665_s14 + $0x60] sm:$0xff] }
  0x82   : > { %1117 = vmatpush1.bf16.msra.mxu0 %v1116_v38  ;;  %v1163_v38 = vpack.c.bf16 %v696_v36, %v695_v35  ;;  %v698_v40 = vld [vmem:[#allocation7 + $0xd8] sm:$0xff]  ;;  %v287_v41 = vld [vmem:[%s1665_s14 + $0x68] sm:$0xff]  ;;  %v288_v43 = vld [vmem:[%s1665_s14 + $0x70] sm:$0xff] }
  0x83   : > { %1119 = vmatprep.subr.bf16.mxu0 %v1118_v39  ;;  %v697_v39 = vld [vmem:[#allocation7 + $0xd0] sm:$0xff]  ;;  %v291_v46 = vld [vmem:[%s1665_s14 + $0x88] sm:$0xff]  ;;  %v294_v49 = vld [vmem:[%s1665_s14 + $0xa0] sm:$0xff] }
  0x84   : > { %1193 = vmatpush1.bf16.msra.mxu1 %v1136_v2  ;;  %v1166_v42 = vpack.c.bf16 %v698_v40, %v697_v39  ;;  %v292_v47 = vld [vmem:[%s1665_s14 + $0x90] sm:$0xff]  ;;  %v699_v50 = vld [vmem:[#allocation7 + $0xe0] sm:$0xff]  ;;  %v297_v59 = vld [vmem:[%s1665_s14 + $0xb8] sm:$0xff] }
  0x85   : > { %1178 = vmatprep.subr.bf16.mxu1 %v1447_v53  ;;  %v701_v55 = vld [vmem:[#allocation7 + $0xf0] sm:$0xff]  ;;  %v301_v62 = vld [vmem:[%s1665_s14 + $0xd8] sm:$0xff]  ;;  %v302_v63 = vld [vmem:[%s1665_s14 + $0xe0] sm:$0xff] }
  0x86   : > { %1121 = vmatpush1.bf16.msra.mxu0 %v1120_v44  ;;  %v289_v44 = vld [vmem:[%s1665_s14 + $0x78] sm:$0xff]  ;;  %v338_v7 = vld [vmem:[%s1968_s2] sm:$0x3] }
  0x87   : > { %1123 = vmatprep.subr.bf16.mxu0 %v1122_v45  ;;  %v290_v45 = vld [vmem:[%s1665_s14 + $0x80] sm:$0xff]  ;;  %v305_v3 = vld [vmem:[%s1665_s14 + $0xf8] sm:$0xff] }
  0x88   : > { %1194 = vmatpush1.bf16.msra.mxu1 %v1139_v6 }
  0x89   : > { %1179 = vmatprep.subr.bf16.mxu1 %v1447_v53 }
  0x8a   : > { %1125 = vmatpush1.bf16.msra.mxu0 %v1124_v48  ;;  %v293_v48 = vld [vmem:[%s1665_s14 + $0x98] sm:$0xff] }
  0x8b   : > { %1126 = vmatprep.subr.bf16.mxu0 %v1447_v53 }
  0x8c   : > { %1195 = vmatpush1.bf16.msra.mxu1 %v1142_v10 }
  0x8d   : > { %415 = vmatmul.mubr.f32.vlgmr.msra.gmra.mrb[0].mxu0 %v274_v51  ;;  %1180 = vmatprep.subr.bf16.mxu1 %v1447_v53  ;;  %v700_v51 = vld [vmem:[#allocation7 + $0xe8] sm:$0xff] }
  0x8e   : > { %420 = vmatprep.mubr.f32.mxu0 %v1446_v0  ;;  %1128 = vmatpush1.bf16.msra.mxu0 %v1127_v52  ;;  %v295_v52 = vld [vmem:[%s1665_s14 + $0xa8] sm:$0xff]  ;;  %v1169_v54 = vpack.c.bf16 %v700_v51, %v699_v50 }
  0x8f   : > { %1129 = vmatprep.subr.bf16.mxu0 %v1447_v53 }
  0x90   : > { %1196 = vmatpush1.bf16.msra.mxu1 %v1145_v14 }
  0x91   : > { %421 = vmatmul.mubr.f32.gmra.mrb[2].mxu0 %v275_v56  ;;  %1181 = vmatprep.subr.bf16.mxu1 %v1447_v53  ;;  %v702_v56 = vld [vmem:[#allocation7 + $0xf8] sm:$0xff] }
  0x92   : > { %426 = vmatprep.mubr.f32.mxu0 %v1446_v0  ;;  %1131 = vmatpush1.bf16.msra.mxu0 %v1130_v57  ;;  %v296_v57 = vld [vmem:[%s1665_s14 + $0xb0] sm:$0xff]  ;;  %v1172_v58 = vpack.c.bf16 %v702_v56, %v701_v55 }
  0x93   : > { %1132 = vmatprep.subr.bf16.mxu0 %v1447_v53 }
  0x94   : > { %1197 = vmatpush1.bf16.msra.mxu1 %v1148_v18 }
  0x95   : > { %427 = vmatmul.mubr.f32.gmra.mrb[4].mxu0 %v276_v60  ;;  %1182 = vmatprep.subr.bf16.mxu1 %v1447_v53  ;;  %v298_v60 = vld [vmem:[%s1665_s14 + $0xc0] sm:$0xff] }
  0x96   : > { %432 = vmatprep.mubr.f32.mxu0 %v1446_v0  ;;  %1134 = vmatpush1.bf16.msra.mxu0 %v1133_v61  ;;  %v299_v61 = vld [vmem:[%s1665_s14 + $0xc8] sm:$0xff] }
  0x97   : > { %1135 = vmatprep.subr.bf16.mxu0 %v1447_v53 }
  0x98   : > { %1198 = vmatpush1.bf16.msra.mxu1 %v1151_v22 }
  0x99   : > { %433 = vmatmul.mubr.f32.gmra.mrb[6].mxu0 %v277_v1  ;;  %1183 = vmatprep.subr.bf16.mxu1 %v1447_v53  ;;  %v303_v1 = vld [vmem:[%s1665_s14 + $0xe8] sm:$0xff] }
  0x9a   : > { %438 = vmatprep.mubr.f32.mxu0 %v1446_v0  ;;  %1137 = vmatpush1.bf16.msra.mxu0 %v1136_v2  ;;  %v304_v2 = vld [vmem:[%s1665_s14 + $0xf0] sm:$0xff] }
  0x9b   : > { %1138 = vmatprep.subr.bf16.mxu0 %v1447_v53 }
  0x9c   : > { %1199 = vmatpush1.bf16.msra.mxu1 %v1154_v26 }
  0x9d   : > { %439 = vmatmul.mubr.f32.gmra.mrb[8].mxu0 %v278_v5  ;;  %1184 = vmatprep.subr.bf16.mxu1 %v1447_v53  ;;  %v341_v5 = vshrl.u32 %v340_v4, 7 }
  0x9e   : > { %444 = vmatprep.mubr.f32.mxu0 %v1446_v0  ;;  %1140 = vmatpush1.bf16.msra.mxu0 %v1139_v6 }
  0x9f   : > { %1141 = vmatprep.subr.bf16.mxu0 %v1447_v53  ;;  %v342_v6 = vsub.s32 0, %v341_v5  ;;  %v346_v8 = vsub.s32 1, %v341_v5 }
  0xa0   : > { %1200 = vmatpush1.bf16.msra.mxu1 %v1157_v30 }
  0xa1   : > { %445 = vmatmul.mubr.f32.gmra.mrb[10].mxu0 %v279_v9  ;;  %1185 = vmatprep.subr.bf16.mxu1 %v1447_v53  ;;  %v1774_v9 = vrot.slane %v338_v7, %v342_v6 }
  0xa2   : > { %450 = vmatprep.mubr.f32.mxu0 %v1446_v0  ;;  %1143 = vmatpush1.bf16.msra.mxu0 %v1142_v10  ;;  %v1776_v10 = vrot.slane %v338_v7, %v346_v8 }
  0xa3   : > { %1144 = vmatprep.subr.bf16.mxu0 %v1447_v53 }
  0xa4   : > { %1201 = vmatpush1.bf16.msra.mxu1 %v1160_v34 }
  0xa5   : > { %451 = vmatmul.mubr.f32.gmra.mrb[12].mxu0 %v280_v13  ;;  %1186 = vmatprep.subr.bf16.mxu1 %v1447_v53 }
  0xa6   : > { %456 = vmatprep.mubr.f32.mxu0 %v1446_v0  ;;  %1146 = vmatpush1.bf16.msra.mxu0 %v1145_v14 }
  0xa7   : > { %1147 = vmatprep.subr.bf16.mxu0 %v1447_v53 }
  0xa8   : > { %1202 = vmatpush1.bf16.msra.mxu1 %v1163_v38 }
  0xa9   : > { %457 = vmatmul.mubr.f32.gmra.mrb[14].mxu0 %v281_v17  ;;  %1187 = vmatprep.subr.bf16.mxu1 %v1447_v53 }
  0xaa   : > { %462 = vmatprep.mubr.f32.mxu0 %v1446_v0  ;;  %1149 = vmatpush1.bf16.msra.mxu0 %v1148_v18 }
  0xab   : > { %1150 = vmatprep.subr.bf16.mxu0 %v1447_v53 }
  0xac   : > { %1203 = vmatpush1.bf16.msra.mxu1 %v1166_v42 }
  0xad   : > { %463 = vmatmul.mubr.f32.gmra.mrb[16].mxu0 %v282_v21  ;;  %1188 = vmatprep.subr.bf16.mxu1 %v1447_v53 }
  0xae   : > { %468 = vmatprep.mubr.f32.mxu0 %v1446_v0  ;;  %1152 = vmatpush1.bf16.msra.mxu0 %v1151_v22 }
  0xaf   : > { %1153 = vmatprep.subr.bf16.mxu0 %v1447_v53 }
  0xb0   : > { %1204 = vmatpush1.bf16.msra.mxu1 %v1169_v54 }
  0xb1   : > { %469 = vmatmul.mubr.f32.gmra.mrb[18].mxu0 %v283_v25  ;;  %1189 = vmatprep.subr.bf16.mxu1 %v1447_v53 }
  0xb2   : > { %474 = vmatprep.mubr.f32.mxu0 %v1446_v0  ;;  %1155 = vmatpush1.bf16.msra.mxu0 %v1154_v26 }
  0xb3   : > { %1156 = vmatprep.subr.bf16.mxu0 %v1447_v53 }
  0xb4   : > { %1205 = vmatpush1.bf16.msra.mxu1 %v1172_v58 }
  0xb5   : > { %475 = vmatmul.mubr.f32.gmra.mrb[20].mxu0 %v284_v29 }
  0xb6   : > { %480 = vmatprep.mubr.f32.mxu0 %v1446_v0  ;;  %1158 = vmatpush1.bf16.msra.mxu0 %v1157_v30 }
  0xb7   : > { %1159 = vmatprep.subr.bf16.mxu0 %v1447_v53 }
  0xb9   : > { %481 = vmatmul.mubr.f32.gmra.mrb[22].mxu0 %v285_v33 }
  0xba   : > { %486 = vmatprep.mubr.f32.mxu0 %v1446_v0  ;;  %1161 = vmatpush1.bf16.msra.mxu0 %v1160_v34 }
  0xbb   : > { %1162 = vmatprep.subr.bf16.mxu0 %v1447_v53 }
  0xbd   : > { %487 = vmatmul.mubr.f32.gmra.mrb[24].mxu0 %v286_v37 }
  0xbe   : > { %492 = vmatprep.mubr.f32.mxu0 %v1446_v0  ;;  %1164 = vmatpush1.bf16.msra.mxu0 %v1163_v38 }
  0xbf   : > { %1165 = vmatprep.subr.bf16.mxu0 %v1447_v53 }
  0xc1   : > { %493 = vmatmul.mubr.f32.gmra.mrb[26].mxu0 %v287_v41 }
  0xc2   : > { %498 = vmatprep.mubr.f32.mxu0 %v1446_v0  ;;  %1167 = vmatpush1.bf16.msra.mxu0 %v1166_v42 }
  0xc3   : > { %1168 = vmatprep.subr.bf16.mxu0 %v1447_v53 }
  0xc5   : > { %499 = vmatmul.mubr.f32.gmra.mrb[28].mxu0 %v288_v43 }
  0xc6   : > { %504 = vmatprep.mubr.f32.mxu0 %v1446_v0  ;;  %1170 = vmatpush1.bf16.msra.mxu0 %v1169_v54 }
  0xc7   : > { %1171 = vmatprep.subr.bf16.mxu0 %v1447_v53  ;;  %v300_v53 = vld [vmem:[%s1665_s14 + $0xd0] sm:$0xff] }
  0xc9   : > { %505 = vmatmul.mubr.f32.gmra.mrb[30].mxu0 %v289_v44 }
  0xca   : > { %510 = vmatprep.mubr.f32.mxu0 %v1446_v0  ;;  %1173 = vmatpush1.bf16.msra.mxu0 %v1172_v58 }
  0xcd   : > { %511 = vmatmul.mubr.f32.gmra.mrb[32].mxu0 %v290_v45 }
  0xce   : > { %516 = vmatprep.mubr.f32.mxu0 %v1446_v0 }
  0xd1   : > { %517 = vmatmul.mubr.f32.gmra.mrb[34].mxu0 %v291_v46 }
  0xd2   : > { %522 = vmatprep.mubr.f32.mxu0 %v1446_v0 }
  0xd5   : > { %523 = vmatmul.mubr.f32.gmra.mrb[36].mxu0 %v292_v47 }
  0xd6   : > { %528 = vmatprep.mubr.f32.mxu0 %v1446_v0 }
  0xd9   : > { %529 = vmatmul.mubr.f32.gmra.mrb[38].mxu0 %v293_v48 }
  0xda   : > { %534 = vmatprep.mubr.f32.mxu0 %v1446_v0 }
  0xdd   : > { %535 = vmatmul.mubr.f32.gmra.mrb[40].mxu0 %v294_v49 }
  0xde   : > { %540 = vmatprep.mubr.f32.mxu0 %v1446_v0 }
  0xe1   : > { %541 = vmatmul.mubr.f32.gmra.mrb[42].mxu0 %v295_v52 }
  0xe2   : > { %546 = vmatprep.mubr.f32.mxu0 %v1446_v0 }
  0xe5   : > { %547 = vmatmul.mubr.f32.gmra.mrb[44].mxu0 %v296_v57 }
  0xe6   : > { %552 = vmatprep.mubr.f32.mxu0 %v1446_v0 }
  0xe9   : > { %553 = vmatmul.mubr.f32.gmra.mrb[46].mxu0 %v297_v59 }
  0xea   : > { %558 = vmatprep.mubr.f32.mxu0 %v1446_v0 }
  0xed   : > { %559 = vmatmul.mubr.f32.gmra.mrb[48].mxu0 %v298_v60 }
  0xee   : > { %564 = vmatprep.mubr.f32.mxu0 %v1446_v0 }
  0xf1   : > { %565 = vmatmul.mubr.f32.gmra.mrb[50].mxu0 %v299_v61 }
  0xf2   : > { %570 = vmatprep.mubr.f32.mxu0 %v1446_v0 }
  0xf5   : > { %571 = vmatmul.mubr.f32.gmra.mrb[52].mxu0 %v300_v53 }
  0xf6   : > { %576 = vmatprep.mubr.f32.mxu0 %v1446_v0 }
  0xf9   : > { %577 = vmatmul.mubr.f32.gmra.mrb[54].mxu0 %v301_v62 }
  0xfa   : > { %582 = vmatprep.mubr.f32.mxu0 %v1446_v0 }
  0xfd   : > { %583 = vmatmul.mubr.f32.gmra.mrb[56].mxu0 %v302_v63 }
  0xfe   : > { %588 = vmatprep.mubr.f32.mxu0 %v1446_v0 }
 0x101   : > { %589 = vmatmul.mubr.f32.gmra.mrb[58].mxu0 %v303_v1 }
 0x102   : > { %594 = vmatprep.mubr.f32.mxu0 %v1446_v0 }
 0x105   : > { %595 = vmatmul.mubr.f32.gmra.mrb[60].mxu0 %v304_v2 }
 0x106   : > { %600 = vmatprep.mubr.f32.mxu0 %v1446_v0 }
 0x109   : > { %601 = vmatmul.mubr.f32.gmra.mrb[62].mxu0 %v305_v3 }
 0x160   : > { %v416_v11 = vpop.f32.mrb[0].mxu0 }
 0x161   : > { %v417_v12 = vadd.f32 %v416_v11, %v1774_v9  ;;  %v418_v13 = vpop.f32.mrb[1].mxu0 }
 0x162   : > { %v419_v0 = vadd.f32 %v418_v13, %v1776_v10 }
 0x163   : > { %v607_v16 = vmax.f32 %v417_v12, 0.0 }
 0x164   : > { %v608_v14 = vmax.f32 %v419_v0, 0.0  ;;  %v422_v15 = vpop.f32.mrb[2].mxu0 }
 0x165   : > { %v423_v17 = vadd.f32 %v422_v15, %v1774_v9  ;;  %v424_v18 = vpop.f32.mrb[3].mxu0 }
 0x166   : > { %v425_v19 = vadd.f32 %v424_v18, %v1776_v10  ;;  %774 = vmatprep.mubr.f32.mxu0 %v608_v14 }
 0x167   : > { %775 = vmatmul.mubr.f32.vlgmr.msra.gmra.mrb[64].mxu0 %v607_v16  ;;  %v609_v22 = vmax.f32 %v423_v17, 0.0 }
 0x168   : > { %v610_v20 = vmax.f32 %v425_v19, 0.0  ;;  %v428_v21 = vpop.f32.mrb[4].mxu0 }
 0x169   : > { %v429_v23 = vadd.f32 %v428_v21, %v1774_v9  ;;  %v430_v24 = vpop.f32.mrb[5].mxu0 }
 0x16a   : > { %v431_v25 = vadd.f32 %v430_v24, %v1776_v10  ;;  %779 = vmatprep.mubr.f32.mxu0 %v610_v20 }
 0x16b   : > { %780 = vmatmul.mubr.f32.gmra.mrb[66].mxu0 %v609_v22  ;;  %v611_v28 = vmax.f32 %v429_v23, 0.0 }
 0x16c   : > { %v612_v26 = vmax.f32 %v431_v25, 0.0  ;;  %v434_v27 = vpop.f32.mrb[6].mxu0 }
 0x16d   : > { %v435_v29 = vadd.f32 %v434_v27, %v1774_v9  ;;  %v436_v30 = vpop.f32.mrb[7].mxu0 }
 0x16e   : > { %v437_v31 = vadd.f32 %v436_v30, %v1776_v10  ;;  %784 = vmatprep.mubr.f32.mxu0 %v612_v26 }
 0x16f   : > { %785 = vmatmul.mubr.f32.gmra.mrb[68].mxu0 %v611_v28  ;;  %v613_v34 = vmax.f32 %v435_v29, 0.0 }
 0x170   : > { %v614_v32 = vmax.f32 %v437_v31, 0.0  ;;  %v440_v33 = vpop.f32.mrb[8].mxu0 }
 0x171   : > { %v441_v35 = vadd.f32 %v440_v33, %v1774_v9  ;;  %v442_v36 = vpop.f32.mrb[9].mxu0 }
 0x172   : > { %789 = vmatprep.mubr.f32.mxu0 %v614_v32  ;;  %v443_v37 = vadd.f32 %v442_v36, %v1776_v10 }
 0x173   : > { %790 = vmatmul.mubr.f32.gmra.mrb[70].mxu0 %v613_v34  ;;  %v615_v40 = vmax.f32 %v441_v35, 0.0 }
 0x174   : > { %v446_v38 = vpop.f32.mrb[10].mxu0  ;;  %v616_v39 = vmax.f32 %v443_v37, 0.0 }
 0x175   : > { %v447_v41 = vadd.f32 %v446_v38, %v1774_v9  ;;  %v448_v42 = vpop.f32.mrb[11].mxu0 }
 0x176   : > { %v449_v43 = vadd.f32 %v448_v42, %v1776_v10  ;;  %794 = vmatprep.mubr.f32.mxu1 %v616_v39 }
 0x177   : > { %795 = vmatmul.mubr.f32.vlgmr.msra.gmra.mrb[0].mxu1 %v615_v40  ;;  %v617_v46 = vmax.f32 %v447_v41, 0.0 }
 0x178   : > { %v618_v44 = vmax.f32 %v449_v43, 0.0  ;;  %v452_v45 = vpop.f32.mrb[12].mxu0 }
 0x179   : > { %v453_v47 = vadd.f32 %v452_v45, %v1774_v9  ;;  %v454_v48 = vpop.f32.mrb[13].mxu0 }
 0x17a   : > { %v455_v49 = vadd.f32 %v454_v48, %v1776_v10  ;;  %799 = vmatprep.mubr.f32.mxu1 %v618_v44 }
 0x17b   : > { %800 = vmatmul.mubr.f32.gmra.mrb[2].mxu1 %v617_v46  ;;  %v619_v52 = vmax.f32 %v453_v47, 0.0 }
 0x17c   : > { %v620_v50 = vmax.f32 %v455_v49, 0.0  ;;  %v458_v51 = vpop.f32.mrb[14].mxu0 }
 0x17d   : > { %v459_v54 = vadd.f32 %v458_v51, %v1774_v9  ;;  %v460_v55 = vpop.f32.mrb[15].mxu0 }
 0x17e   : > { %v461_v56 = vadd.f32 %v460_v55, %v1776_v10  ;;  %804 = vmatprep.mubr.f32.mxu1 %v620_v50 }
 0x17f   : > { %805 = vmatmul.mubr.f32.gmra.mrb[4].mxu1 %v619_v52  ;;  %v621_v59 = vmax.f32 %v459_v54, 0.0 }
 0x180   : > { %v622_v57 = vmax.f32 %v461_v56, 0.0  ;;  %v464_v58 = vpop.f32.mrb[16].mxu0 }
 0x181   : > { %v465_v60 = vadd.f32 %v464_v58, %v1774_v9  ;;  %v466_v61 = vpop.f32.mrb[17].mxu0 }
 0x182   : > { %v467_v53 = vadd.f32 %v466_v61, %v1776_v10  ;;  %809 = vmatprep.mubr.f32.mxu1 %v622_v57 }
 0x183   : > { %810 = vmatmul.mubr.f32.gmra.mrb[6].mxu1 %v621_v59  ;;  %v623_v1 = vmax.f32 %v465_v60, 0.0 }
 0x184   : > { %v624_v62 = vmax.f32 %v467_v53, 0.0  ;;  %v470_v63 = vpop.f32.mrb[18].mxu0 }
 0x185   : > { %v471_v2 = vadd.f32 %v470_v63, %v1774_v9  ;;  %v472_v3 = vpop.f32.mrb[19].mxu0 }
 0x186   : > { %v473_v4 = vadd.f32 %v472_v3, %v1776_v10  ;;  %814 = vmatprep.mubr.f32.mxu1 %v624_v62 }
 0x187   : > { %815 = vmatmul.mubr.f32.gmra.mrb[8].mxu1 %v623_v1  ;;  %v625_v7 = vmax.f32 %v471_v2, 0.0 }
 0x188   : > { %v626_v5 = vmax.f32 %v473_v4, 0.0  ;;  %v476_v6 = vpop.f32.mrb[20].mxu0 }
 0x189   : > { %v477_v8 = vadd.f32 %v476_v6, %v1774_v9  ;;  %v478_v11 = vpop.f32.mrb[21].mxu0 }
 0x18a   : > { %v479_v12 = vadd.f32 %v478_v11, %v1776_v10  ;;  %819 = vmatprep.mubr.f32.mxu1 %v626_v5 }
 0x18b   : > { %820 = vmatmul.mubr.f32.gmra.mrb[10].mxu1 %v625_v7  ;;  %v627_v14 = vmax.f32 %v477_v8, 0.0 }
 0x18c   : > { %v628_v13 = vmax.f32 %v479_v12, 0.0  ;;  %v482_v0 = vpop.f32.mrb[22].mxu0 }
 0x18d   : > { %v483_v15 = vadd.f32 %v482_v0, %v1774_v9  ;;  %v484_v16 = vpop.f32.mrb[23].mxu0 }
 0x18e   : > { %v485_v17 = vadd.f32 %v484_v16, %v1776_v10  ;;  %824 = vmatprep.mubr.f32.mxu1 %v628_v13 }
 0x18f   : > { %825 = vmatmul.mubr.f32.gmra.mrb[12].mxu1 %v627_v14  ;;  %v629_v20 = vmax.f32 %v483_v15, 0.0 }
 0x190   : > { %v630_v18 = vmax.f32 %v485_v17, 0.0  ;;  %v488_v19 = vpop.f32.mrb[24].mxu0 }
 0x191   : > { %v489_v21 = vadd.f32 %v488_v19, %v1774_v9  ;;  %v490_v22 = vpop.f32.mrb[25].mxu0 }
 0x192   : > { %v491_v23 = vadd.f32 %v490_v22, %v1776_v10  ;;  %829 = vmatprep.mubr.f32.mxu1 %v630_v18 }
 0x193   : > { %830 = vmatmul.mubr.f32.gmra.mrb[14].mxu1 %v629_v20  ;;  %v631_v26 = vmax.f32 %v489_v21, 0.0 }
 0x194   : > { %v632_v24 = vmax.f32 %v491_v23, 0.0  ;;  %v494_v25 = vpop.f32.mrb[26].mxu0 }
 0x195   : > { %v495_v27 = vadd.f32 %v494_v25, %v1774_v9  ;;  %v496_v28 = vpop.f32.mrb[27].mxu0 }
 0x196   : > { %v497_v29 = vadd.f32 %v496_v28, %v1776_v10  ;;  %834 = vmatprep.mubr.f32.mxu1 %v632_v24 }
 0x197   : > { %835 = vmatmul.mubr.f32.gmra.mrb[16].mxu1 %v631_v26  ;;  %v633_v32 = vmax.f32 %v495_v27, 0.0 }
 0x198   : > { %v634_v30 = vmax.f32 %v497_v29, 0.0  ;;  %v500_v31 = vpop.f32.mrb[28].mxu0 }
 0x199   : > { %v501_v33 = vadd.f32 %v500_v31, %v1774_v9  ;;  %v502_v34 = vpop.f32.mrb[29].mxu0 }
 0x19a   : > { %v503_v35 = vadd.f32 %v502_v34, %v1776_v10  ;;  %839 = vmatprep.mubr.f32.mxu1 %v634_v30 }
 0x19b   : > { %840 = vmatmul.mubr.f32.gmra.mrb[18].mxu1 %v633_v32  ;;  %v635_v38 = vmax.f32 %v501_v33, 0.0 }
 0x19c   : > { %v636_v36 = vmax.f32 %v503_v35, 0.0  ;;  %v506_v37 = vpop.f32.mrb[30].mxu0 }
 0x19d   : > { %v507_v39 = vadd.f32 %v506_v37, %v1774_v9  ;;  %v508_v40 = vpop.f32.mrb[31].mxu0 }
 0x19e   : > { %v509_v41 = vadd.f32 %v508_v40, %v1776_v10  ;;  %844 = vmatprep.mubr.f32.mxu1 %v636_v36 }
 0x19f   : > { %845 = vmatmul.mubr.f32.gmra.mrb[20].mxu1 %v635_v38  ;;  %v637_v44 = vmax.f32 %v507_v39, 0.0 }
 0x1a0   : > { %v638_v42 = vmax.f32 %v509_v41, 0.0  ;;  %v512_v43 = vpop.f32.mrb[32].mxu0 }
 0x1a1   : > { %v513_v45 = vadd.f32 %v512_v43, %v1774_v9  ;;  %v514_v46 = vpop.f32.mrb[33].mxu0 }
 0x1a2   : > { %v515_v47 = vadd.f32 %v514_v46, %v1776_v10  ;;  %849 = vmatprep.mubr.f32.mxu1 %v638_v42 }
 0x1a3   : > { %850 = vmatmul.mubr.f32.gmra.mrb[22].mxu1 %v637_v44  ;;  %v639_v50 = vmax.f32 %v513_v45, 0.0 }
 0x1a4   : > { %v640_v48 = vmax.f32 %v515_v47, 0.0  ;;  %v518_v49 = vpop.f32.mrb[34].mxu0 }
 0x1a5   : > { %v519_v51 = vadd.f32 %v518_v49, %v1774_v9  ;;  %v520_v52 = vpop.f32.mrb[35].mxu0 }
 0x1a6   : > { %v521_v54 = vadd.f32 %v520_v52, %v1776_v10  ;;  %854 = vmatprep.mubr.f32.mxu1 %v640_v48 }
 0x1a7   : > { %855 = vmatmul.mubr.f32.gmra.mrb[24].mxu1 %v639_v50  ;;  %v641_v57 = vmax.f32 %v519_v51, 0.0 }
 0x1a8   : > { %v642_v55 = vmax.f32 %v521_v54, 0.0  ;;  %v524_v56 = vpop.f32.mrb[36].mxu0 }
 0x1a9   : > { %v525_v58 = vadd.f32 %v524_v56, %v1774_v9  ;;  %v526_v59 = vpop.f32.mrb[37].mxu0 }
 0x1aa   : > { %v527_v60 = vadd.f32 %v526_v59, %v1776_v10  ;;  %859 = vmatprep.mubr.f32.mxu1 %v642_v55 }
 0x1ab   : > { %860 = vmatmul.mubr.f32.gmra.mrb[26].mxu1 %v641_v57  ;;  %v643_v62 = vmax.f32 %v525_v58, 0.0 }
 0x1ac   : > { %v644_v61 = vmax.f32 %v527_v60, 0.0  ;;  %v530_v53 = vpop.f32.mrb[38].mxu0 }
 0x1ad   : > { %v531_v63 = vadd.f32 %v530_v53, %v1774_v9  ;;  %v532_v1 = vpop.f32.mrb[39].mxu0 }
 0x1ae   : > { %v533_v2 = vadd.f32 %v532_v1, %v1776_v10  ;;  %864 = vmatprep.mubr.f32.mxu1 %v644_v61 }
 0x1af   : > { %865 = vmatmul.mubr.f32.gmra.mrb[28].mxu1 %v643_v62  ;;  %v645_v5 = vmax.f32 %v531_v63, 0.0 }
 0x1b0   : > { %v646_v3 = vmax.f32 %v533_v2, 0.0  ;;  %v536_v4 = vpop.f32.mrb[40].mxu0 }
 0x1b1   : > { %v537_v6 = vadd.f32 %v536_v4, %v1774_v9  ;;  %v538_v7 = vpop.f32.mrb[41].mxu0 }
 0x1b2   : > { %v539_v8 = vadd.f32 %v538_v7, %v1776_v10  ;;  %869 = vmatprep.mubr.f32.mxu1 %v646_v3 }
 0x1b3   : > { %870 = vmatmul.mubr.f32.gmra.mrb[30].mxu1 %v645_v5  ;;  %v647_v13 = vmax.f32 %v537_v6, 0.0 }
 0x1b4   : > { %v648_v11 = vmax.f32 %v539_v8, 0.0  ;;  %v542_v12 = vpop.f32.mrb[42].mxu0 }
 0x1b5   : > { %v543_v0 = vadd.f32 %v542_v12, %v1774_v9  ;;  %v544_v14 = vpop.f32.mrb[43].mxu0 }
 0x1b6   : > { %v545_v15 = vadd.f32 %v544_v14, %v1776_v10  ;;  %874 = vmatprep.mubr.f32.mxu1 %v648_v11 }
 0x1b7   : > { %875 = vmatmul.mubr.f32.gmra.mrb[32].mxu1 %v647_v13  ;;  %v649_v18 = vmax.f32 %v543_v0, 0.0 }
 0x1b8   : > { %v650_v16 = vmax.f32 %v545_v15, 0.0  ;;  %v548_v17 = vpop.f32.mrb[44].mxu0 }
 0x1b9   : > { %v549_v19 = vadd.f32 %v548_v17, %v1774_v9  ;;  %v550_v20 = vpop.f32.mrb[45].mxu0 }
 0x1ba   : > { %v551_v21 = vadd.f32 %v550_v20, %v1776_v10  ;;  %879 = vmatprep.mubr.f32.mxu1 %v650_v16  ;;  %v1845_v16 = vld [vmem:[%s1970_s4] ss:$0 sm:$0xff] }
 0x1bb   : > { %880 = vmatmul.mubr.f32.gmra.mrb[34].mxu1 %v649_v18  ;;  %v651_v24 = vmax.f32 %v549_v19, 0.0 }
 0x1bc   : > { %v652_v22 = vmax.f32 %v551_v21, 0.0  ;;  %v554_v23 = vpop.f32.mrb[46].mxu0 }
 0x1bd   : > { %v555_v25 = vadd.f32 %v554_v23, %v1774_v9  ;;  %v556_v26 = vpop.f32.mrb[47].mxu0 }
 0x1be   : > { %v557_v27 = vadd.f32 %v556_v26, %v1776_v10  ;;  %884 = vmatprep.mubr.f32.mxu1 %v652_v22 }
 0x1bf   : > { %885 = vmatmul.mubr.f32.gmra.mrb[36].mxu1 %v651_v24  ;;  %v653_v30 = vmax.f32 %v555_v25, 0.0 }
 0x1c0   : > { %v654_v28 = vmax.f32 %v557_v27, 0.0  ;;  %v560_v29 = vpop.f32.mrb[48].mxu0 }
 0x1c1   : > { %v561_v31 = vadd.f32 %v560_v29, %v1774_v9  ;;  %v562_v32 = vpop.f32.mrb[49].mxu0 }
 0x1c2   : > { %v563_v33 = vadd.f32 %v562_v32, %v1776_v10  ;;  %889 = vmatprep.mubr.f32.mxu1 %v654_v28 }
 0x1c3   : > { %890 = vmatmul.mubr.f32.gmra.mrb[38].mxu1 %v653_v30  ;;  %v655_v36 = vmax.f32 %v561_v31, 0.0 }
 0x1c4   : > { %v656_v34 = vmax.f32 %v563_v33, 0.0  ;;  %v566_v35 = vpop.f32.mrb[50].mxu0 }
 0x1c5   : > { %v567_v37 = vadd.f32 %v566_v35, %v1774_v9  ;;  %v568_v38 = vpop.f32.mrb[51].mxu0 }
 0x1c6   : > { %v569_v39 = vadd.f32 %v568_v38, %v1776_v10  ;;  %894 = vmatprep.mubr.f32.mxu1 %v656_v34 }
 0x1c7   : > { %895 = vmatmul.mubr.f32.gmra.mrb[40].mxu1 %v655_v36  ;;  %v657_v42 = vmax.f32 %v567_v37, 0.0 }
 0x1c8   : > { %v658_v40 = vmax.f32 %v569_v39, 0.0  ;;  %v572_v41 = vpop.f32.mrb[52].mxu0 }
 0x1c9   : > { %v573_v43 = vadd.f32 %v572_v41, %v1774_v9  ;;  %v574_v44 = vpop.f32.mrb[53].mxu0 }
 0x1ca   : > { %v575_v45 = vadd.f32 %v574_v44, %v1776_v10  ;;  %899 = vmatprep.mubr.f32.mxu1 %v658_v40 }
 0x1cb   : > { %900 = vmatmul.mubr.f32.gmra.mrb[42].mxu1 %v657_v42  ;;  %v659_v48 = vmax.f32 %v573_v43, 0.0 }
 0x1cc   : > { %v660_v46 = vmax.f32 %v575_v45, 0.0  ;;  %v578_v47 = vpop.f32.mrb[54].mxu0 }
 0x1cd   : > { %v579_v49 = vadd.f32 %v578_v47, %v1774_v9  ;;  %v580_v50 = vpop.f32.mrb[55].mxu0 }
 0x1ce   : > { %v581_v51 = vadd.f32 %v580_v50, %v1776_v10  ;;  %904 = vmatprep.mubr.f32.mxu1 %v660_v46 }
 0x1cf   : > { %905 = vmatmul.mubr.f32.gmra.mrb[44].mxu1 %v659_v48  ;;  %v661_v55 = vmax.f32 %v579_v49, 0.0 }
 0x1d0   : > { %v662_v52 = vmax.f32 %v581_v51, 0.0  ;;  %v584_v54 = vpop.f32.mrb[56].mxu0 }
 0x1d1   : > { %v585_v56 = vadd.f32 %v584_v54, %v1774_v9  ;;  %v586_v57 = vpop.f32.mrb[57].mxu0 }
 0x1d2   : > { %v587_v58 = vadd.f32 %v586_v57, %v1776_v10  ;;  %909 = vmatprep.mubr.f32.mxu1 %v662_v52 }
 0x1d3   : > { %910 = vmatmul.mubr.f32.gmra.mrb[46].mxu1 %v661_v55  ;;  %v663_v61 = vmax.f32 %v585_v56, 0.0 }
 0x1d4   : > { %v664_v59 = vmax.f32 %v587_v58, 0.0  ;;  %v590_v60 = vpop.f32.mrb[58].mxu0 }
 0x1d5   : > { %v591_v53 = vadd.f32 %v590_v60, %v1774_v9  ;;  %v592_v62 = vpop.f32.mrb[59].mxu0 }
 0x1d6   : > { %v593_v63 = vadd.f32 %v592_v62, %v1776_v10  ;;  %914 = vmatprep.mubr.f32.mxu1 %v664_v59 }
 0x1d7   : > { %915 = vmatmul.mubr.f32.gmra.mrb[48].mxu1 %v663_v61  ;;  %v665_v3 = vmax.f32 %v591_v53, 0.0 }
 0x1d8   : > { %v666_v1 = vmax.f32 %v593_v63, 0.0  ;;  %v596_v2 = vpop.f32.mrb[60].mxu0 }
 0x1d9   : > { %v597_v4 = vadd.f32 %v596_v2, %v1774_v9  ;;  %v598_v5 = vpop.f32.mrb[61].mxu0 }
 0x1da   : > { %v599_v6 = vadd.f32 %v598_v5, %v1776_v10  ;;  %919 = vmatprep.mubr.f32.mxu1 %v666_v1 }
 0x1db   : > { %920 = vmatmul.mubr.f32.gmra.mrb[50].mxu1 %v665_v3  ;;  %v667_v11 = vmax.f32 %v597_v4, 0.0 }
 0x1dc   : > { %v668_v7 = vmax.f32 %v599_v6, 0.0  ;;  %v602_v8 = vpop.f32.mrb[62].mxu0 }
 0x1dd   : > { %v603_v12 = vadd.f32 %v602_v8, %v1774_v9  ;;  %v604_v13 = vpop.f32.mrb[63].mxu0 }
 0x1de   : > { %v605_v0 = vadd.f32 %v604_v13, %v1776_v10  ;;  %924 = vmatprep.mubr.f32.mxu1 %v668_v7 }
 0x1df   : > { %925 = vmatmul.mubr.f32.gmra.mrb[52].mxu1 %v667_v11  ;;  %v669_v15 = vmax.f32 %v603_v12, 0.0 }
 0x1e0   : > { %v670_v14 = vmax.f32 %v605_v0, 0.0 }
 0x1e2   : > { %929 = vmatprep.mubr.f32.mxu1 %v670_v14 }
 0x1e3   : > { %930 = vmatmul.mubr.f32.gmra.mrb[54].mxu1 %v669_v15 }
 0x23a   : > { %v776_v17 = vpop.f32.mrb[64].mxu0 }
 0x23b   : > { %v777_v18 = vadd.f32 %v1845_v16, %v776_v17  ;;  %v778_v19 = vpop.f32.mrb[65].mxu0 }
 0x23d   : > { %935 = vst [vmem:[%s1850_s10] sm:$0xff] %v777_v18 }
 0x23e   : > { %v781_v9 = vpop.f32.mrb[66].mxu0 }
 0x23f   : > { %v782_v10 = vadd.f32 %v1845_v16, %v781_v9  ;;  %v783_v20 = vpop.f32.mrb[67].mxu0 }
 0x241   : > { %936 = vst [vmem:[%s1850_s10 + $0x8] sm:$0xff] %v782_v10 }
 0x242   : > { %v786_v21 = vpop.f32.mrb[68].mxu0 }
 0x243   : > { %v787_v22 = vadd.f32 %v1845_v16, %v786_v21  ;;  %v788_v23 = vpop.f32.mrb[69].mxu0 }
 0x245   : > { %937 = vst [vmem:[%s1850_s10 + $0x10] sm:$0xff] %v787_v22 }
 0x246   : > { %v791_v24 = vpop.f32.mrb[70].mxu0 }
 0x247   : > { %v792_v25 = vadd.f32 %v1845_v16, %v791_v24  ;;  %v793_v26 = vpop.f32.mrb[71].mxu0 }
 0x249   : > { %938 = vst [vmem:[%s1850_s10 + $0x18] sm:$0xff] %v792_v25 }
 0x24a   : > { %v796_v27 = vpop.f32.mrb[0].mxu1 }
 0x24b   : > { %v797_v28 = vadd.f32 %v1845_v16, %v796_v27  ;;  %v798_v29 = vpop.f32.mrb[1].mxu1 }
 0x24d   : > { %939 = vst [vmem:[%s1850_s10 + $0x20] sm:$0xff] %v797_v28 }
 0x24e   : > { %v801_v30 = vpop.f32.mrb[2].mxu1 }
 0x24f   : > { %v802_v31 = vadd.f32 %v1845_v16, %v801_v30  ;;  %v803_v32 = vpop.f32.mrb[3].mxu1 }
 0x251   : > { %940 = vst [vmem:[%s1850_s10 + $0x28] sm:$0xff] %v802_v31 }
 0x252   : > { %v806_v33 = vpop.f32.mrb[4].mxu1 }
 0x253   : > { %v807_v34 = vadd.f32 %v1845_v16, %v806_v33  ;;  %v808_v35 = vpop.f32.mrb[5].mxu1 }
 0x255   : > { %941 = vst [vmem:[%s1850_s10 + $0x30] sm:$0xff] %v807_v34 }
 0x256   : > { %v811_v36 = vpop.f32.mrb[6].mxu1 }
 0x257   : > { %v812_v37 = vadd.f32 %v1845_v16, %v811_v36  ;;  %v813_v38 = vpop.f32.mrb[7].mxu1 }
 0x259   : > { %942 = vst [vmem:[%s1850_s10 + $0x38] sm:$0xff] %v812_v37 }
 0x25a   : > { %v816_v39 = vpop.f32.mrb[8].mxu1 }
 0x25b   : > { %v817_v40 = vadd.f32 %v1845_v16, %v816_v39  ;;  %v818_v41 = vpop.f32.mrb[9].mxu1 }
 0x25d   : > { %943 = vst [vmem:[%s1850_s10 + $0x40] sm:$0xff] %v817_v40 }
 0x25e   : > { %v821_v42 = vpop.f32.mrb[10].mxu1 }
 0x25f   : > { %v822_v43 = vadd.f32 %v1845_v16, %v821_v42  ;;  %v823_v44 = vpop.f32.mrb[11].mxu1 }
 0x261   : > { %944 = vst [vmem:[%s1850_s10 + $0x48] sm:$0xff] %v822_v43 }
 0x262   : > { %v826_v45 = vpop.f32.mrb[12].mxu1 }
 0x263   : > { %v827_v46 = vadd.f32 %v1845_v16, %v826_v45  ;;  %v828_v47 = vpop.f32.mrb[13].mxu1 }
 0x265   : > { %945 = vst [vmem:[%s1850_s10 + $0x50] sm:$0xff] %v827_v46 }
 0x266   : > { %v831_v48 = vpop.f32.mrb[14].mxu1 }
 0x267   : > { %v832_v49 = vadd.f32 %v1845_v16, %v831_v48  ;;  %v833_v50 = vpop.f32.mrb[15].mxu1 }
 0x269   : > { %946 = vst [vmem:[%s1850_s10 + $0x58] sm:$0xff] %v832_v49 }
 0x26a   : > { %v836_v51 = vpop.f32.mrb[16].mxu1 }
 0x26b   : > { %v837_v52 = vadd.f32 %v1845_v16, %v836_v51  ;;  %v838_v54 = vpop.f32.mrb[17].mxu1 }
 0x26d   : > { %947 = vst [vmem:[%s1850_s10 + $0x60] sm:$0xff] %v837_v52 }
 0x26e   : > { %v841_v55 = vpop.f32.mrb[18].mxu1 }
 0x26f   : > { %v842_v56 = vadd.f32 %v1845_v16, %v841_v55  ;;  %v843_v57 = vpop.f32.mrb[19].mxu1 }
 0x271   : > { %948 = vst [vmem:[%s1850_s10 + $0x68] sm:$0xff] %v842_v56 }
 0x272   : > { %v846_v58 = vpop.f32.mrb[20].mxu1 }
 0x273   : > { %v847_v59 = vadd.f32 %v1845_v16, %v846_v58  ;;  %v848_v60 = vpop.f32.mrb[21].mxu1 }
 0x275   : > { %949 = vst [vmem:[%s1850_s10 + $0x70] sm:$0xff] %v847_v59 }
 0x276   : > { %v851_v61 = vpop.f32.mrb[22].mxu1 }
 0x277   : > { %v852_v53 = vadd.f32 %v1845_v16, %v851_v61  ;;  %v853_v62 = vpop.f32.mrb[23].mxu1 }
 0x279   : > { %950 = vst [vmem:[%s1850_s10 + $0x78] sm:$0xff] %v852_v53 }
 0x27a   : > { %v856_v63 = vpop.f32.mrb[24].mxu1 }
 0x27b   : > { %v857_v1 = vadd.f32 %v1845_v16, %v856_v63  ;;  %v858_v2 = vpop.f32.mrb[25].mxu1 }
 0x27d   : > { %951 = vst [vmem:[%s1850_s10 + $0x80] sm:$0xff] %v857_v1 }
 0x27e   : > { %v861_v3 = vpop.f32.mrb[26].mxu1 }
 0x27f   : > { %v862_v4 = vadd.f32 %v1845_v16, %v861_v3  ;;  %v863_v5 = vpop.f32.mrb[27].mxu1 }
 0x281   : > { %952 = vst [vmem:[%s1850_s10 + $0x88] sm:$0xff] %v862_v4 }
 0x282   : > { %v866_v6 = vpop.f32.mrb[28].mxu1 }
 0x283   : > { %v867_v7 = vadd.f32 %v1845_v16, %v866_v6  ;;  %v868_v8 = vpop.f32.mrb[29].mxu1 }
 0x285   : > { %953 = vst [vmem:[%s1850_s10 + $0x90] sm:$0xff] %v867_v7 }
 0x286   : > { %v871_v11 = vpop.f32.mrb[30].mxu1 }
 0x287   : > { %v872_v12 = vadd.f32 %v1845_v16, %v871_v11  ;;  %v873_v13 = vpop.f32.mrb[31].mxu1 }
 0x289   : > { %954 = vst [vmem:[%s1850_s10 + $0x98] sm:$0xff] %v872_v12 }
 0x28a   : > { %v876_v0 = vpop.f32.mrb[32].mxu1 }
 0x28b   : > { %v877_v14 = vadd.f32 %v1845_v16, %v876_v0  ;;  %v878_v15 = vpop.f32.mrb[33].mxu1 }
 0x28d   : > { %955 = vst [vmem:[%s1850_s10 + $0xa0] sm:$0xff] %v877_v14 }
 0x28e   : > { %v881_v17 = vpop.f32.mrb[34].mxu1 }
 0x28f   : > { %v882_v18 = vadd.f32 %v1845_v16, %v881_v17  ;;  %v883_v19 = vpop.f32.mrb[35].mxu1 }
 0x291   : > { %956 = vst [vmem:[%s1850_s10 + $0xa8] sm:$0xff] %v882_v18 }
 0x292   : > { %v886_v9 = vpop.f32.mrb[36].mxu1 }
 0x293   : > { %v887_v10 = vadd.f32 %v1845_v16, %v886_v9  ;;  %v888_v20 = vpop.f32.mrb[37].mxu1 }
 0x295   : > { %957 = vst [vmem:[%s1850_s10 + $0xb0] sm:$0xff] %v887_v10 }
 0x296   : > { %v891_v21 = vpop.f32.mrb[38].mxu1 }
 0x297   : > { %v892_v22 = vadd.f32 %v1845_v16, %v891_v21  ;;  %v893_v23 = vpop.f32.mrb[39].mxu1 }
 0x299   : > { %958 = vst [vmem:[%s1850_s10 + $0xb8] sm:$0xff] %v892_v22 }
 0x29a   : > { %v896_v24 = vpop.f32.mrb[40].mxu1 }
 0x29b   : > { %v897_v25 = vadd.f32 %v1845_v16, %v896_v24  ;;  %v898_v26 = vpop.f32.mrb[41].mxu1 }
 0x29d   : > { %959 = vst [vmem:[%s1850_s10 + $0xc0] sm:$0xff] %v897_v25 }
 0x29e   : > { %v901_v27 = vpop.f32.mrb[42].mxu1 }
 0x29f   : > { %v902_v28 = vadd.f32 %v1845_v16, %v901_v27  ;;  %v903_v29 = vpop.f32.mrb[43].mxu1 }
 0x2a1   : > { %960 = vst [vmem:[%s1850_s10 + $0xc8] sm:$0xff] %v902_v28 }
 0x2a2   : > { %v906_v30 = vpop.f32.mrb[44].mxu1 }
 0x2a3   : > { %v907_v31 = vadd.f32 %v1845_v16, %v906_v30  ;;  %v908_v32 = vpop.f32.mrb[45].mxu1 }
 0x2a5   : > { %961 = vst [vmem:[%s1850_s10 + $0xd0] sm:$0xff] %v907_v31 }
 0x2a6   : > { %v911_v33 = vpop.f32.mrb[46].mxu1 }
 0x2a7   : > { %v912_v34 = vadd.f32 %v1845_v16, %v911_v33  ;;  %v913_v35 = vpop.f32.mrb[47].mxu1 }
 0x2a9   : > { %962 = vst [vmem:[%s1850_s10 + $0xd8] sm:$0xff] %v912_v34 }
 0x2aa   : > { %v916_v36 = vpop.f32.mrb[48].mxu1 }
 0x2ab   : > { %v917_v37 = vadd.f32 %v1845_v16, %v916_v36  ;;  %v918_v38 = vpop.f32.mrb[49].mxu1 }
 0x2ad   : > { %963 = vst [vmem:[%s1850_s10 + $0xe0] sm:$0xff] %v917_v37 }
 0x2ae   : > { %v921_v39 = vpop.f32.mrb[50].mxu1 }
 0x2af   : > { %v922_v40 = vadd.f32 %v1845_v16, %v921_v39  ;;  %v923_v41 = vpop.f32.mrb[51].mxu1 }
 0x2b1   : > { %964 = vst [vmem:[%s1850_s10 + $0xe8] sm:$0xff] %v922_v40 }
 0x2b2   : > { %v926_v42 = vpop.f32.mrb[52].mxu1 }
 0x2b3   : > { %v927_v43 = vadd.f32 %v1845_v16, %v926_v42  ;;  %v928_v44 = vpop.f32.mrb[53].mxu1 }
 0x2b5   : > { %965 = vst [vmem:[%s1850_s10 + $0xf0] sm:$0xff] %v927_v43 }
 0x2b6   : > { %v931_v45 = vpop.f32.mrb[54].mxu1 }
 0x2b7   : > { %v932_v46 = vadd.f32 %v1845_v16, %v931_v45  ;;  %v933_v47 = vpop.f32.mrb[55].mxu1 }
 0x2b9   : > { %966 = vst [vmem:[%s1850_s10 + $0xf8] sm:$0xff] %v932_v46 }
 0x2ba   : > { %1380 = shalt.err (!%p1377_p2)
}
 0x2bb   : > { %s1381_s14 = scalar_lea.hbm %s1918_s11, 4096  ;;  %s1385_s12 = scalar_lea.hbm %s1971_s5, 8192 }
 0x2bc   : > { %p1382_p13 = scmp.ne.s32.totalorder %s1918_s11, %s1381_s14  ;;  %p1386_p4 = scmp.lt.u32.totalorder %s1918_s11, %s1971_s5 }
 0x2bd   : > { %p1387_p7 = scmp.lt.u32.totalorder %s1385_s12, %s1381_s14  ;;  %p1389_p11 = scmp.lt.u32.totalorder %s1381_s14, %s1918_s11 }
 0x2be   : > { %p1383_p6 = pnand %p1382_p13, %p1985_p0 }
 0x2bf   : > { %p1388_p8 = por %p1387_p7, %p1386_p4 }
 0x2c0   : > { %p1384_p10 = pneg %p1383_p6 }
 0x2c1   : > { %p1390_p1 = por %p1389_p11, %p1388_p8 }
 0x2c3   : > { %p1391_p3 = pnand %p1390_p1, %p1384_p10 }
 0x2c5   : > { %1394 = shalt.err (!%p1391_p3)
}
 0x2c6   : > { %s1449_s28 = smov 128   ;;  %s1450_s9 = smov 8  }
 0x2c7   : > { %1216 = dma.vmem_to_hbm [thread:$0]  (%p1985_p0), %s1920_s15, 4096, %s1918_s11, %s968_s23, %s1449_s28, %s1449_s28, %s1450_s9  }
 0x2c8 PF: > { %s996_s30 = sand.u32 1, %s1425_s18   ;;  %p1986_p5 = scmp.ne.s32.totalorder %s1976_s25, 0 }
 0x2c9   : > { %p1987_p9 = scmp.ge.s32.totalorder %s1437_s21, 2  ;;  %s997_s7 = scalar_lea.sflag [#allocation4], %s996_s30 }
 0x2cb   : > { %p1230_p12 = pnand %p1987_p9, %p1986_p5 }
 0x2cd   : > { %1420 = dma.done.wait (!%p1230_p12), %s997_s7, 4096  }
 0x2ce   : > { %1422 = vsyncadd (!%p1230_p12), %s997_s7, 4294963200  ;;  %p19_p2 = scmp.ge.s32.totalorder %s1594_s16, 4   ;;  %s1988_s18 = smov %s1429_s19 }
 0x2cf   : > { %s1989_s19 = smov %s1433_s20  ;;  %s1990_s20 = smov %s1603_s27 }
 0x2d0   : > { %s1991_s21 = smov %s1594_s16  ;;  %21 = sbr.rel (!%p19_p2) target bundleno = 6 (0x6), region = 93 }
 0x2d7   :  { %1002 = vsyncpa [#allocation3], 1 }
 0x2d8   :  { %1004 = vsyncpa [#allocation3 + $0x1], 1 }
 0x2d9   :  { %1005 = vsyncpa [#allocation6], 1 }
 0x2da   :  { %1006 = vsyncpa [#allocation4], 1 }
 0x2db   :  { %1008 = vsyncpa [#allocation4 + $0x1], 1 }

</bundles_post_ra>
